<compile_context>
chip_gen: v5e
topology: v5e:2x2
jax: 0.10.0
libtpu: 0.0.40
codegen_flags: <defaults>
</compile_context>

<pallas_src>
import functools

import jax
import jax.numpy as jnp
from jax.experimental import pallas as pl
from jax.experimental.pallas import tpu as pltpu


def _preemphasis_kernel(x_ref, o_ref, carry_ref, *, coef: float):
    x = x_ref[...]                                   # (bt, tt) tile in VMEM
    # prev[:, t] = x[:, t-1] within the tile; column 0 wraps and is fixed below.
    # NOTE: pltpu.roll requires a non-negative axis (axis=-1 raises "out of range").
    prev = pltpu.roll(x, shift=1, axis=1)
    o_ref[...] = (x - coef * prev).astype(o_ref.dtype)

    t = pl.program_id(1)

    @pl.when(t == 0)
    def _():
        # Global first column: reflect padding -> the sample "before" t=0 is x[:, 1].
        o_ref[:, 0:1] = (x[:, 0:1] - coef * x[:, 1:2]).astype(o_ref.dtype)

    @pl.when(t != 0)
    def _():
        # Halo: the previous sample is the last column of the previous time tile,
        # carried in VMEM scratch (time axis is sequential / "arbitrary").
        o_ref[:, 0:1] = (x[:, 0:1] - coef * carry_ref[...]).astype(o_ref.dtype)

    # Save this tile's last column for the next time tile of the same batch block.
    carry_ref[...] = x[:, -1:]


def _pick_tile(dim: int, unit: int, max_tile: int) -> int:
    """Largest tile <= max_tile that is a multiple of `unit` and divides `dim`.
    Falls back to the full dimension (always a legal BlockSpec block size)."""
    if dim <= max_tile:
        return dim
    t = (max_tile // unit) * unit
    while t >= unit:
        if dim % t == 0:
            return t
        t -= unit
    return dim


def pre_emphasis(x: jax.Array, coef: float = 0.97, *,
                 batch_tile: int | None = None,
                 time_tile: int | None = None) -> jax.Array:
    assert x.ndim == 2, "The number of dimensions of input tensor must be 2!"
    B, T = x.shape
    assert T >= 2, "reflect padding requires T >= 2"

    # Lane-dense time tiles (multiple of 128, capped at 1024 -> ~86% of HBM roofline
    # on v6e, small enough to fit v5e's 16 MiB / v7x's 32 MiB scoped VMEM with
    # double buffering). Batch tiles are multiples of 8 (or full B).
    bt = batch_tile if batch_tile is not None else _pick_tile(B, 8, 64)
    tt = time_tile if time_tile is not None else _pick_tile(T, 128, 1024)
    assert B % bt == 0 and T % tt == 0
    assert tt >= 2

    kernel = functools.partial(_preemphasis_kernel, coef=coef)
    grid = (B // bt, T // tt)  # time innermost so the halo carry is valid

    return pl.pallas_call(
        kernel,
        out_shape=jax.ShapeDtypeStruct((B, T), x.dtype),
        grid_spec=pltpu.PrefetchScalarGridSpec(
            num_scalar_prefetch=0,
            grid=grid,
            in_specs=[pl.BlockSpec((bt, tt), lambda i, t: (i, t))],
            out_specs=pl.BlockSpec((bt, tt), lambda i, t: (i, t)),
            scratch_shapes=[pltpu.VMEM((bt, 1), x.dtype)],
        ),
        compiler_params=pltpu.CompilerParams(
            dimension_semantics=("parallel", "arbitrary")),
    )(x)


if __name__ == "__main__":
    key = jax.random.PRNGKey(0)
    B, T = 4, 256
    x = jax.random.normal(key, (B, T), dtype=jnp.float32)

    coef = 0.97  # deterministic "flipped_filter" = [-coef, 1.0], as in __init__

    # Force two time tiles so both the reflect (t==0) and halo-carry (t>0) paths run.
    y = pre_emphasis(x, coef=coef, batch_tile=B, time_tile=128)
    y = jax.block_until_ready(y)

    # Pure-JAX reference for the reflect-padded conv1d semantics.
    prev_ref = jnp.concatenate([x[:, 1:2], x[:, :-1]], axis=-1)
    y_ref = x - coef * prev_ref
    assert y.shape == (B, T)
    assert jnp.allclose(y, y_ref, atol=1e-6), "mismatch vs reference"

    print("KERNEL_OK")
</pallas_src>

<mosaic_0001>
module attributes {stable_mosaic.version = 11 : i64} {
  func.func @_preemphasis_kernel(%arg0: i32, %arg1: i32, %arg2: memref<4x128xf32, #tpu.memory_space<vmem>>, %arg3: memref<4x128xf32, #tpu.memory_space<vmem>>, %arg4: memref<4x1xf32, #tpu.memory_space<vmem>>) attributes {dimension_semantics = [#tpu.dimension_semantics<parallel>, #tpu.dimension_semantics<arbitrary>], iteration_bounds = array<i64: 1, 2>, scalar_prefetch = 0 : i64, scratch_operands = 1 : i64, tpu.core_type = #tpu.core_type<tc>, window_params = [{transform_indices = @transform_0, window_bounds = array<i64: 4, 128>}, {transform_indices = @transform_1, window_bounds = array<i64: 4, 128>}]} {
    %c0 = arith.constant 0 : index
    %c0_0 = arith.constant 0 : index
    %0 = vector.load %arg2[%c0, %c0_0] : memref<4x128xf32, #tpu.memory_space<vmem>>, vector<4x128xf32>
    %c1_i32 = arith.constant 1 : i32
    %1 = tpu.dynamic_rotate %0 by %c1_i32 dim 1 : vector<4x128xf32>, i32 -> vector<4x128xf32>
    %cst = arith.constant 9.700000e-01 : f32
    %2 = vector.broadcast %cst : f32 to vector<4x128xf32>
    %3 = arith.mulf %2, %1 : vector<4x128xf32>
    %4 = arith.subf %0, %3 : vector<4x128xf32>
    %c0_1 = arith.constant 0 : index
    %c0_2 = arith.constant 0 : index
    %5 = vector.load %arg3[%c0_1, %c0_2] : memref<4x128xf32, #tpu.memory_space<vmem>>, vector<4x128xf32>
    tpu.vector_store %arg3[%c0_1, %c0_2], %4 {strides = array<i32>} : memref<4x128xf32, #tpu.memory_space<vmem>>, vector<4x128xf32>,
    %c0_i32 = arith.constant 0 : i32
    %6 = arith.cmpi eq, %arg1, %c0_i32 : i32
    %7 = arith.extui %6 : i1 to i32
    %c0_i32_3 = arith.constant 0 : i32
    %8 = arith.cmpi ne, %7, %c0_i32_3 : i32
    scf.if %8 {
      %14 = vector.extract_strided_slice %0 {offsets = [0, 0], sizes = [4, 1], strides = [1, 1]} : vector<4x128xf32> to vector<4x1xf32>
      %15 = vector.extract_strided_slice %0 {offsets = [0, 1], sizes = [4, 1], strides = [1, 1]} : vector<4x128xf32> to vector<4x1xf32>
      %cst_8 = arith.constant 9.700000e-01 : f32
      %16 = vector.broadcast %cst_8 : f32 to vector<4x1xf32>
      %17 = arith.mulf %16, %15 : vector<4x1xf32>
      %18 = arith.subf %14, %17 : vector<4x1xf32>
      %c0_9 = arith.constant 0 : index
      %c0_10 = arith.constant 0 : index
      %19 = vector.load %arg3[%c0_9, %c0_10] : memref<4x128xf32, #tpu.memory_space<vmem>>, vector<4x1xf32>
      tpu.vector_store %arg3[%c0_9, %c0_10], %18 {strides = array<i32>} : memref<4x128xf32, #tpu.memory_space<vmem>>, vector<4x1xf32>,
    } else {
    }
    %c0_i32_4 = arith.constant 0 : i32
    %9 = arith.cmpi ne, %arg1, %c0_i32_4 : i32
    %10 = arith.extui %9 : i1 to i32
    %c0_i32_5 = arith.constant 0 : i32
    %11 = arith.cmpi ne, %10, %c0_i32_5 : i32
    scf.if %11 {
      %14 = vector.extract_strided_slice %0 {offsets = [0, 0], sizes = [4, 1], strides = [1, 1]} : vector<4x128xf32> to vector<4x1xf32>
      %c0_8 = arith.constant 0 : index
      %c0_9 = arith.constant 0 : index
      %15 = vector.load %arg4[%c0_8, %c0_9] : memref<4x1xf32, #tpu.memory_space<vmem>>, vector<4x1xf32>
      %cst_10 = arith.constant 9.700000e-01 : f32
      %16 = vector.broadcast %cst_10 : f32 to vector<4x1xf32>
      %17 = arith.mulf %16, %15 : vector<4x1xf32>
      %18 = arith.subf %14, %17 : vector<4x1xf32>
      %c0_11 = arith.constant 0 : index
      %c0_12 = arith.constant 0 : index
      %19 = vector.load %arg3[%c0_11, %c0_12] : memref<4x128xf32, #tpu.memory_space<vmem>>, vector<4x1xf32>
      tpu.vector_store %arg3[%c0_11, %c0_12], %18 {strides = array<i32>} : memref<4x128xf32, #tpu.memory_space<vmem>>, vector<4x1xf32>,
    } else {
    }
    %12 = vector.extract_strided_slice %0 {offsets = [0, 127], sizes = [4, 1], strides = [1, 1]} : vector<4x128xf32> to vector<4x1xf32>
    %c0_6 = arith.constant 0 : index
    %c0_7 = arith.constant 0 : index
    %13 = vector.load %arg4[%c0_6, %c0_7] : memref<4x1xf32, #tpu.memory_space<vmem>>, vector<4x1xf32>
    tpu.vector_store %arg4[%c0_6, %c0_7], %12 {strides = array<i32>} : memref<4x1xf32, #tpu.memory_space<vmem>>, vector<4x1xf32>,
    return
  }
  func.func @transform_0(%arg0: i32, %arg1: i32) -> (i32, i32) {
    %c0_i32 = arith.constant 0 : i32
    return %arg0, %arg1 : i32, i32
  }
  func.func @transform_1(%arg0: i32, %arg1: i32) -> (i32, i32) {
    %c0_i32 = arith.constant 0 : i32
    return %arg0, %arg1 : i32, i32
  }
}

</mosaic_0001>

<bundles_post_ra>
// kernel: tpu_custom_call.1
= control target key start
LH: loop header
LB: loop body
LE: loop exit
PB: predicated region body
PF: predicated region fallthrough
CT: control target
= control target key end

     0   :  { %6 = vsyncpa [#allocation4], 0  ;;  %s612_s0 = inlined_call_operand.hbm [shape: f32[4,256], index: 0, kind: input, shape index: {}]   ;;  %s613_s1 = inlined_call_operand.hbm [shape: f32[4,256], index: 1, kind: output, shape index: {}]  }
   0x1   :  { %8 = vsyncpa [#allocation4 + $0x1], 0 }
   0x2   :  { %9 = vsyncpa [#allocation5], 0 }
   0x3   :  { %11 = vsyncpa [#allocation5 + $0x1], 0  ;;  %s490_s6 = smov 0   ;;  %s492_s7 = smov 0  }
   0x4   :  { %s494_s8 = smov 0   ;;  %s496_s9 = smov 0  }
   0x5   :  { %s498_s10 = smov 0   ;;  %s500_s11 = smov 0  }
   0x6 LB: > { %s285_s12 = sadd.s32 4294967295, %s476_s11   ;;  %s286_s13 = sadd.s32 4294967294, %s476_s11   ;;  %s476_s11 = sphi %s500_s11, %s17_s11   ;;  %s472_s10 = sphi %s498_s10, %s622_s10   ;;  %s468_s9 = sphi %s496_s9, %s621_s9   ;;  %s464_s8 = sphi %s494_s8, %s620_s8   ;;  %s460_s7 = sphi %s492_s7, %s619_s7   ;;  %s456_s6 = sphi %s490_s6, %s618_s6  }
   0x7   : > { %s26_s14 = sadd.s32 1, %s472_s10  ;;  %s38_s15 = sadd.s32 1, %s464_s8 }
   0x8   : > { %p27_p0 = scmp.ge.s32.totalorder %s26_s14, 2  ;;  %p45_p1 = scmp.ne.s32.totalorder %s464_s8, %s460_s7 }
   0x9   : > { %p46_p2 = scmp.eq.s32.totalorder %s476_s11, 0  ;;  %p51_p3 = scmp.ne.s32.totalorder %s460_s7, %s456_s6 }
   0xa   : > { %s624_s14 = smov (%p27_p0, %s26_s14), 0  ;;  %p52_p5 = scmp.eq.s32.totalorder %s285_s12, 0 }
   0xb   : > { %p531_p4 = por %p46_p2, %p45_p1  ;;  %s34_s17 = ssub.s32 %s472_s10, %s624_s14 }
   0xc   : > { %p77_p6 = scmp.eq.s32.totalorder %s285_s12, 1  ;;  %p36_p7 = scmp.eq.s32.totalorder %s34_s17, 0 }
   0xd   : > { %p537_p8 = por %p52_p5, %p51_p3  ;;  %p83_p10 = scmp.eq.s32.totalorder %s286_s13, 1 }
   0xe   : > { %p541_p9 = por %p77_p6, %p45_p1  ;;  %p288_p12 = scmp.ge.s32.totalorder %s476_s11, 2 }
   0xf   : > { %s546_s20 = scalar_select %p36_p7, %s464_s8, %s38_s15  }
  0x10   : > { %p548_p11 = por %p83_p10, %p51_p3  ;;  %p312_p13 = scmp.lt.s32.totalorder %s476_s11, 2 }
  0x11   : > { %s103_s22 = sand.u32 1, %s464_s8   ;;  %s290_s24 = sshll.u32 %s472_s10, 2 }
  0x12   : > { %s289_s23 = sshll.u32 %s103_s22, 2  ;;  %s113_s27 = scalar_lea.hbm %s612_s0, %s290_s24 }
  0x13   : > { %s107_s28 = scalar_lea.vmem [#allocation3], %s289_s23  ;;  %s115_s30 = sshll.u32 %s113_s27, 4  ;;  %s116_s30 = int_to_ptr.hbm [resolvable:$true] %s115_s30 }
  0x14   : > { %s117_s29 = sshll.u32 %s107_s28, 4  ;;  %p305_p0 = pnand %p312_p13, %p531_p4  ;;  %s118_s29 = int_to_ptr.vmem [resolvable:$true] %s117_s29 }
  0x15   : > { %p291_p1 = scmp.ge.s32.totalorder %s476_s11, 1  ;;  %p122_p2 = scmp.lt.s32.totalorder %s476_s11, 3 }
  0x16   : > { %s104_s2 = scalar_lea.sflag [#allocation4], %s103_s22 }
  0x17   : > { %307 = dma.hbm_to_vmem [thread:$0]  (!%p305_p0), %s116_s30, 64, %s118_s29, %s104_s2  }
  0x18   : > { %p123_p3 = pnand %p291_p1, %p122_p2 }
  0x19   : > { %s564_s3 = sand.u32 (!%p123_p3), 1, %s460_s7  }
  0x1a   : > { %126 = sbr.rel (%p123_p3) target bundleno = 402 (0x192), region = 24  ;;  %s292_s4 = sshll.u32 (!%p123_p3), %s564_s3, 2 }
  0x1b   : > { %s129_s5 = scalar_lea.sflag (!%p123_p3), [#allocation4], %s564_s3  ;;  %s132_s12 = scalar_lea.vmem (!%p123_p3), [#allocation3], %s292_s4 }
  0x1f   : > { %447 = dma.done.wait (%p537_p8), %s129_s5, 64  }
  0x20   : > { %449 = vsyncadd (%p537_p8), %s129_s5, 4294967232  ;;  %v152_v0 = vld [vmem:[%s132_s12] sm:$0xf]  ;;  %s478_s13 = smov 1   ;;  %s151_s15 = scalar_lea.vmem [#allocation6], %s292_s4 }
  0x21   : > { %153 = vrot.lane.b32.xlu0 %v152_v0, %s478_s13  ;;  %p294_p4 = scmp.ne.s32.totalorder %s468_s9, 0 }
  0x22   : > { %s479_s16 = smov (!%p294_p4), 127  }
  0x93   : > { %v154_v1 = vpop.permute.xlu0 %153 }
  0x94   : > { %v155_v2 = vmul.f32 0.97, %v154_v1  ;;  %161 = sbr.rel (%p294_p4) target bundleno = 273 (0x111), region = 32 }
  0x96   : > { %v156_v3 = vsub.f32 %v152_v0, %v155_v2 }
  0x98   : > { %157 = vst [vmem:[%s151_s15] sm:$0xf] %v156_v3 }
  0x99   : > { %v162_v4 = vmul.f32 0.97, %v152_v0  ;;  %vm168_vm0 = vcmask 3072  }
  0x9b   : > { %164 = vrot.lane.b32.xlu0 %v162_v4, %s479_s16 }
 0x10d   : > { %v165_v5 = vpop.permute.xlu0 %164 }
 0x10e   : > { %v167_v6 = vsub.f32 %v152_v0, %v165_v5 }
 0x110   : > { %169 = vst.msk [vmem:[%s151_s15] sm:$0xf] %vm168_vm0, %v167_v6 }
 0x111 PF: > { %p295_p5 = scmp.eq.s32.totalorder %s468_s9, 0 }
 0x113   : > { %173 = sbr.rel (%p295_p5) target bundleno = 286 (0x11e), region = 36 }
 0x118   : > { %v174_v7 = vld [vmem:[#allocation2] sm:$0xf]  ;;  %vm177_vm1 = vcmask 3072  }
 0x119   : > { %v175_v8 = vmul.f32 0.97, %v174_v7 }
 0x11b   : > { %v176_v9 = vsub.f32 %v152_v0, %v175_v8 }
 0x11d   : > { %178 = vst.msk [vmem:[%s151_s15] sm:$0xf] %vm177_vm1, %v176_v9 }
 0x11e PF: > { %180 = vrot.lane.b32.xlu0 %v152_v0, %s478_s13  ;;  %s297_s17 = sshll.u32 %s468_s9, 2  ;;  %s200_s24 = sshll.u32 %s151_s15, 4  ;;  %s201_s24 = int_to_ptr.vmem [resolvable:$true] %s200_s24 }
 0x11f   : > { %s198_s23 = scalar_lea.hbm %s613_s1, %s297_s17  ;;  %s186_s26 = scalar_lea.sflag [#allocation5], %s564_s3 }
 0x120   : > { %s202_s25 = sshll.u32 %s198_s23, 4  ;;  %s414_s9 = scalar_lea.hbm %s613_s1, 8  ;;  %s203_s25 = int_to_ptr.hbm [resolvable:$true] %s202_s25 }
 0x121   : > { %s408_s27 = sshra.s32 %s203_s25, 4  ;;  %s409_s27 = int_to_ptr.hbm [resolvable:$true] %s408_s27 }
 0x122   : > { %s410_s28 = scalar_lea.hbm %s409_s27, 4  ;;  %p415_p10 = scmp.lt.s32.totalorder %s409_s27, %s613_s1 }
 0x123   : > { %p411_p6 = scmp.ne.s32.totalorder %s409_s27, %s410_s28  ;;  %p416_p13 = scmp.lt.s32.totalorder %s414_s9, %s410_s28 }
 0x125   : > { %p412_p7 = pnand %p411_p6, %p541_p9  ;;  %p417_p0 = por %p416_p13, %p415_p10 }
 0x127   : > { %p413_p8 = pneg %p412_p7 }
 0x129   : > { %p418_p1 = pnand %p417_p0, %p413_p8 }
 0x12b   : > { %421 = shalt.err (!%p418_p1)
}
 0x12c   : > { %302 = dma.vmem_to_hbm [thread:$0]  (%p541_p9), %s201_s24, 64, %s203_s25, %s186_s26   ;;  %vm183_vm2 = vcmask 3072  }
 0x190   : > { %v181_v10 = vpop.permute.xlu0 %180 }
 0x191   : > { %184 = vst.msk [vmem:[#allocation2] sm:$0xf] %vm183_vm2, %v181_v10 }
 0x192 PF: > { %s214_s3 = sand.u32 1, %s456_s6   ;;  %p309_p2 = pnand %p288_p12, %p548_p11 }
 0x193   : > { %s215_s5 = scalar_lea.sflag [#allocation5], %s214_s3 }
 0x194   : > { %p310_p3 = pneg %p309_p2 }
 0x196   : > { %451 = dma.done.wait (%p310_p3), %s215_s5, 64  }
 0x197   : > { %453 = vsyncadd (%p310_p3), %s215_s5, 4294967232  ;;  %s17_s11 = sadd.s32 1, %s476_s11   ;;  %s618_s6 = smov %s460_s7 }
 0x198   : > { %p14_p4 = scmp.ge.s32.totalorder %s17_s11, 4   ;;  %s619_s7 = smov %s464_s8 }
 0x199   : > { %s620_s8 = smov %s546_s20  ;;  %s621_s9 = smov %s472_s10 }
 0x19a   : > { %s622_s10 = smov %s624_s14  ;;  %16 = sbr.rel (!%p14_p4) target bundleno = 6 (0x6), region = 77 }
 0x19f   :  { %221 = vsyncpa [#allocation4], 1 }
 0x1a0   :  { %223 = vsyncpa [#allocation4 + $0x1], 1 }
 0x1a1   :  { %224 = vsyncpa [#allocation5], 1 }
 0x1a2   :  { %226 = vsyncpa [#allocation5 + $0x1], 1 }

</bundles_post_ra>
